<compile_context>
chip_gen: v7x
topology: tpu7x:2x2x1
jax: 0.10.0
libtpu: 0.0.40
codegen_flags: <defaults>
</compile_context>

<pallas_src>
import jax
import jax.numpy as jnp
from jax.experimental import pallas as pl
from jax.experimental.pallas import tpu as pltpu

# DensePose head output resolution (fixed by the model architecture).
HEAT_H = 112
HEAT_W = 112
BODY_INDEXES = list(range(1, 25))  # default indexes [1..24] -> contiguous slice


def _pick_lane_chunk(hw: int, max_lanes: int) -> int:
    """Largest divisor of hw that is a multiple of 128 and <= max_lanes.

    Falls back to the full extent (legal as a full-dim block) if hw is not a
    multiple of 128."""
    if hw % 128 != 0:
        return hw
    best = 128
    for k in range(1, hw // 128 + 1):
        c = 128 * k
        if hw % c == 0 and c <= max_lanes:
            best = c
    return best


# ----------------------------------------------------------------------------
# Kernel 1: image preprocessing   img[:, [2,1,0]] * 255   (lane-dense layout)
# ----------------------------------------------------------------------------
def _preprocess_kernel(img_ref, out_ref):
    # img_ref / out_ref: (3, L) flattened H*W chunk (RGB in -> BGR out, *255)
    out_ref[0:1, :] = img_ref[2:3, :] * 255.0
    out_ref[1:2, :] = img_ref[1:2, :] * 255.0
    out_ref[2:3, :] = img_ref[0:1, :] * 255.0


def preprocess_image(img):
    B, C, H, W = img.shape
    assert C == 3
    HW = H * W
    chunk = _pick_lane_chunk(HW, max_lanes=16384)
    flat = img.reshape(B, 3, HW)
    out = pl.pallas_call(
        _preprocess_kernel,
        out_shape=jax.ShapeDtypeStruct((B, 3, HW), img.dtype),
        grid_spec=pltpu.PrefetchScalarGridSpec(
            num_scalar_prefetch=0,
            grid=(B, HW // chunk),
            in_specs=[pl.BlockSpec((None, 3, chunk), lambda b, s: (b, 0, s))],
            out_specs=pl.BlockSpec((None, 3, chunk), lambda b, s: (b, 0, s)),
        ),
        compiler_params=pltpu.CompilerParams(
            dimension_semantics=("parallel", "parallel")),
    )(flat)
    return out.reshape(B, 3, H, W)


# ----------------------------------------------------------------------------
# Kernel 2: DensePose post-processing (lane-dense, fused normalization)
#   coarse = softmax(coarse_logits, ch); person_prob = coarse[:, 1]
#   fine   = softmax(fine_logits, ch)
#   body   = (fine * person_prob)[:, 1:25]
# which is computed as:
#   body[c] = exp(fine[c+1]-fmax) / ((1 + exp(coarse0-coarse1)) * sum_exp_fine)
# ----------------------------------------------------------------------------
def _densepose_body_kernel(coarse_ref, fine_ref, out_ref):
    # coarse_ref: (2, L)   fine_ref: (25, L)   out_ref: (24, L)
    fine = fine_ref[...].astype(jnp.float32)             # (25, L)
    f_max = jnp.max(fine, axis=0, keepdims=True)         # (1, L)
    f_exp = jnp.exp(fine - f_max)                        # (25, L)
    f_den = jnp.sum(f_exp, axis=0, keepdims=True)        # (1, L)

    coarse = coarse_ref[...].astype(jnp.float32)          # (2, L)
    # person_prob = sigmoid(c1 - c0) = 1 / (1 + exp(c0 - c1)): one exp, and the
    # coarse + fine normalizations share a single reciprocal.
    denom = (1.0 + jnp.exp(coarse[0:1, :] - coarse[1:2, :])) * f_den  # (1, L)
    scale = pl.reciprocal(denom, approx=False)            # (1, L)

    # fuse and select body-part channels [1..24] (static contiguous slice)
    out_ref[...] = (f_exp[1:25, :] * scale).astype(out_ref.dtype)


def densepose_body(coarse_logits, fine_logits, out_dtype=jnp.float32):
    B, Cc, H, W = coarse_logits.shape
    Bf, Cf, Hf, Wf = fine_logits.shape
    assert (B, H, W) == (Bf, Hf, Wf) and Cc == 2 and Cf == 25
    HW = H * W                                   # 112*112 = 12544 = 98 * 128
    chunk = _pick_lane_chunk(HW, max_lanes=8192)  # -> 6272 lanes, grid (B, 2)
    coarse2 = coarse_logits.reshape(B, 2, HW)     # contiguous reshape: free
    fine2 = fine_logits.reshape(B, 25, HW)
    out = pl.pallas_call(
        _densepose_body_kernel,
        out_shape=jax.ShapeDtypeStruct((B, 24, HW), out_dtype),
        grid_spec=pltpu.PrefetchScalarGridSpec(
            num_scalar_prefetch=0,
            grid=(B, HW // chunk),
            in_specs=[
                pl.BlockSpec((None, 2, chunk), lambda b, s: (b, 0, s)),
                pl.BlockSpec((None, 25, chunk), lambda b, s: (b, 0, s)),
            ],
            out_specs=pl.BlockSpec((None, 24, chunk), lambda b, s: (b, 0, s)),
        ),
        compiler_params=pltpu.CompilerParams(
            dimension_semantics=("parallel", "parallel")),
    )(coarse2, fine2)
    return out.reshape(B, 24, H, W)


# ----------------------------------------------------------------------------
# Module-level forward (glue in plain JAX, hot path in Pallas)
# ----------------------------------------------------------------------------
def dense_net_forward(img, coarse_logits, fine_logits):
    # Image preprocessing as in the original forward (BGR swap, *255).  This is
    # the tensor that would be fed to the R-CNN; it is returned so the kernel
    # actually executes (not dead code) even though the R-CNN cannot run here.
    model_input = preprocess_image(img)
    # TODO(synk): the Detectron2 DensePose R-CNN inference (self.model.inference)
    # and the per-instance bbox / empty-detection fallback logic are not
    # reproducible in-script; coarse_logits / fine_logits stand in for the
    # stacked per-image head outputs (the tensors fed to torch.softmax).
    body = densepose_body(coarse_logits, fine_logits)
    return body, model_input


def _reference_body(coarse_logits, fine_logits):
    coarse = jax.nn.softmax(coarse_logits.astype(jnp.float32), axis=1)
    person = coarse[:, 1:2]
    fine = jax.nn.softmax(fine_logits.astype(jnp.float32), axis=1)
    fused = fine * person
    return fused[:, jnp.array(BODY_INDEXES)]


if __name__ == "__main__":
    key = jax.random.PRNGKey(0)
    k_img, k_coarse, k_fine = jax.random.split(key, 3)

    B = 2
    img = jax.random.uniform(k_img, (B, 3, 16, 16), dtype=jnp.float32)  # pixels in [0,1]
    coarse_logits = jax.random.normal(k_coarse, (B, 2, HEAT_H, HEAT_W), dtype=jnp.float32)
    fine_logits = jax.random.normal(k_fine, (B, 25, HEAT_H, HEAT_W), dtype=jnp.float32)

    body, model_input = dense_net_forward(img, coarse_logits, fine_logits)
    body = jax.block_until_ready(body)
    model_input = jax.block_until_ready(model_input)

    # check preprocessing (BGR swap + *255)
    pre_ref = img[:, ::-1, :, :] * 255.0
    assert model_input.shape == img.shape
    assert jnp.max(jnp.abs(model_input - pre_ref)) < 1e-4

    # check DensePose post-processing against the pure-JAX reference
    ref = jax.block_until_ready(_reference_body(coarse_logits, fine_logits))
    assert body.shape == (B, 24, HEAT_H, HEAT_W)
    assert jnp.max(jnp.abs(body - ref)) < 1e-5

    print("KERNEL_OK")
</pallas_src>

<mosaic_0001>
module attributes {stable_mosaic.version = 11 : i64} {
  func.func @_preprocess_kernel(%arg0: i32, %arg1: i32, %arg2: memref<1x3x256xf32, #tpu.memory_space<vmem>>, %arg3: memref<1x3x256xf32, #tpu.memory_space<vmem>>) attributes {dimension_semantics = [#tpu.dimension_semantics<parallel>, #tpu.dimension_semantics<parallel>], iteration_bounds = array<i64: 2, 1>, scalar_prefetch = 0 : i64, scratch_operands = 0 : i64, tpu.core_type = #tpu.core_type<tc>, window_params = [{transform_indices = @transform_0, window_bounds = array<i64: 1, 3, 256>}, {transform_indices = @transform_1, window_bounds = array<i64: 1, 3, 256>}]} {
    %c0 = arith.constant 0 : index
    %c2 = arith.constant 2 : index
    %c0_0 = arith.constant 0 : index
    %0 = vector.load %arg2[%c0, %c2, %c0_0] : memref<1x3x256xf32, #tpu.memory_space<vmem>>, vector<1x1x256xf32>
    %1 = vector.shape_cast %0 : vector<1x1x256xf32> to vector<1x256xf32>
    %cst = arith.constant 2.550000e+02 : f32
    %2 = vector.broadcast %cst : f32 to vector<1x256xf32>
    %3 = arith.mulf %1, %2 : vector<1x256xf32>
    %c0_1 = arith.constant 0 : index
    %c0_2 = arith.constant 0 : index
    %c0_3 = arith.constant 0 : index
    %4 = vector.load %arg3[%c0_1, %c0_2, %c0_3] : memref<1x3x256xf32, #tpu.memory_space<vmem>>, vector<1x1x256xf32>
    %5 = vector.shape_cast %4 : vector<1x1x256xf32> to vector<1x256xf32>
    %6 = vector.shape_cast %3 : vector<1x256xf32> to vector<1x1x256xf32>
    tpu.vector_store %arg3[%c0_1, %c0_2, %c0_3], %6 {strides = array<i32>} : memref<1x3x256xf32, #tpu.memory_space<vmem>>, vector<1x1x256xf32>,
    %c0_4 = arith.constant 0 : index
    %c1 = arith.constant 1 : index
    %c0_5 = arith.constant 0 : index
    %7 = vector.load %arg2[%c0_4, %c1, %c0_5] : memref<1x3x256xf32, #tpu.memory_space<vmem>>, vector<1x1x256xf32>
    %8 = vector.shape_cast %7 : vector<1x1x256xf32> to vector<1x256xf32>
    %cst_6 = arith.constant 2.550000e+02 : f32
    %9 = vector.broadcast %cst_6 : f32 to vector<1x256xf32>
    %10 = arith.mulf %8, %9 : vector<1x256xf32>
    %c0_7 = arith.constant 0 : index
    %c1_8 = arith.constant 1 : index
    %c0_9 = arith.constant 0 : index
    %11 = vector.load %arg3[%c0_7, %c1_8, %c0_9] : memref<1x3x256xf32, #tpu.memory_space<vmem>>, vector<1x1x256xf32>
    %12 = vector.shape_cast %11 : vector<1x1x256xf32> to vector<1x256xf32>
    %13 = vector.shape_cast %10 : vector<1x256xf32> to vector<1x1x256xf32>
    tpu.vector_store %arg3[%c0_7, %c1_8, %c0_9], %13 {strides = array<i32>} : memref<1x3x256xf32, #tpu.memory_space<vmem>>, vector<1x1x256xf32>,
    %c0_10 = arith.constant 0 : index
    %c0_11 = arith.constant 0 : index
    %c0_12 = arith.constant 0 : index
    %14 = vector.load %arg2[%c0_10, %c0_11, %c0_12] : memref<1x3x256xf32, #tpu.memory_space<vmem>>, vector<1x1x256xf32>
    %15 = vector.shape_cast %14 : vector<1x1x256xf32> to vector<1x256xf32>
    %cst_13 = arith.constant 2.550000e+02 : f32
    %16 = vector.broadcast %cst_13 : f32 to vector<1x256xf32>
    %17 = arith.mulf %15, %16 : vector<1x256xf32>
    %c0_14 = arith.constant 0 : index
    %c2_15 = arith.constant 2 : index
    %c0_16 = arith.constant 0 : index
    %18 = vector.load %arg3[%c0_14, %c2_15, %c0_16] : memref<1x3x256xf32, #tpu.memory_space<vmem>>, vector<1x1x256xf32>
    %19 = vector.shape_cast %18 : vector<1x1x256xf32> to vector<1x256xf32>
    %20 = vector.shape_cast %17 : vector<1x256xf32> to vector<1x1x256xf32>
    tpu.vector_store %arg3[%c0_14, %c2_15, %c0_16], %20 {strides = array<i32>} : memref<1x3x256xf32, #tpu.memory_space<vmem>>, vector<1x1x256xf32>,
    return
  }
  func.func @transform_0(%arg0: i32, %arg1: i32) -> (i32, i32, i32) {
    %c0_i32 = arith.constant 0 : i32
    %c0_i32_0 = arith.constant 0 : i32
    return %arg0, %c0_i32, %arg1 : i32, i32, i32
  }
  func.func @transform_1(%arg0: i32, %arg1: i32) -> (i32, i32, i32) {
    %c0_i32 = arith.constant 0 : i32
    %c0_i32_0 = arith.constant 0 : i32
    return %arg0, %c0_i32, %arg1 : i32, i32, i32
  }
}

</mosaic_0001>

<bundles_post_ra>
// kernel: tpu_custom_call.1
= control target key start
LH: loop header
LB: loop body
LE: loop exit
PB: predicated region body
PF: predicated region fallthrough
CT: control target
= control target key end

     0   :  { %s335_s6 = smov 0   ;;  %s337_s7 = smov 0   ;;  %s361_s0 = inlined_call_operand.vmem [shape: f32[2,3,256], index: 0, kind: input, shape index: {}]   ;;  %s362_s1 = inlined_call_operand.vmem [shape: f32[2,3,256], index: 1, kind: output, shape index: {}]  }
   0x1   :  { %s339_s8 = smov 0  }
   0x2 LB: > { %s23_s9 = sadd.s32 1, %s319_s7  ;;  %p264_p0 = scmp.ge.s32.totalorder %s323_s8, 1  ;;  %s323_s8 = sphi %s339_s8, %s11_s8   ;;  %s319_s7 = sphi %s337_s7, %s364_s7   ;;  %s315_s6 = sphi %s335_s6, %s363_s6  }
   0x3   : > { %p25_p1 = scmp.ge.s32.totalorder %s23_s9, 2  ;;  %p108_p2 = scmp.lt.s32.totalorder %s323_s8, 3 }
   0x5   : > { %s366_s9 = smov (%p25_p1, %s23_s9), 0  ;;  %p109_p3 = pnand %p264_p0, %p108_p2 }
   0x6   : > { %p137_p4 = scmp.lt.s32.totalorder (!%p109_p3), %s315_s6, 1  ;;  %v159_v0 = vlaneseq (!%p109_p3) }
   0x7   : > { %112 = sbr.rel (%p109_p3) target bundleno = 22 (0x16), region = 24 }
   0x8   : > { %vm161_vm0 = vcmp.lt.s32.totalorder (!%p109_p3), %v159_v0, 256 }
   0xe   : > { %s368_s6 = smov (!%p137_p4, %s315_s6), 1 }
   0xf   : > { %s275_s10 = sshll.u32 %s368_s6, 3 }
  0x10   : > { %s144_s13 = scalar_lea.vmem %s361_s0, %s275_s10  ;;  %s154_s16 = scalar_lea.vmem %s362_s1, %s275_s10 }
  0x11   : > { %v269_v1 = vld [vmem:[%s144_s13 + $0x2] ss:$4 sm:$0x3]  ;;  %v270_v2 = vld [vmem:[%s144_s13 + $0x1] ss:$4 sm:$0x3] }
  0x12   : > { %v158_v3 = vmul.f32 255.0, %v269_v1  ;;  %v166_v4 = vmul.f32 255.0, %v270_v2  ;;  %v169_v5 = vld [vmem:[%s144_s13] ss:$4 sm:$0x3] }
  0x13   : > { %v170_v6 = vmul.f32 255.0, %v169_v5 }
  0x14   : > { %163 = vst.msk [vmem:[%s154_s16] ss:$4 sm:$0x3] %vm161_vm0, %v158_v3  ;;  %271 = vst.msk [vmem:[%s154_s16 + $0x1] ss:$4 sm:$0x3] %vm161_vm0, %v166_v4 }
  0x15   : > { %272 = vst.msk [vmem:[%s154_s16 + $0x2] ss:$4 sm:$0x3] %vm161_vm0, %v170_v6 }
  0x16 PF: > { %s11_s8 = sadd.s32 1, %s323_s8   ;;  %s363_s6 = smov %s319_s7 }
  0x17   : > { %p8_p5 = scmp.ge.s32.totalorder %s11_s8, 4   ;;  %s364_s7 = smov %s366_s9 }
  0x19   :  { %10 = sbr.rel (!%p8_p5) target bundleno = 2 (0x2), region = 58 }

</bundles_post_ra>
